<compile_context>
chip_gen: v6e
topology: v6e:2x2x1
jax: 0.10.0
libtpu: 0.0.40
codegen_flags: <defaults>
</compile_context>

<pallas_src>
import jax
import jax.numpy as jnp
from jax.experimental import pallas as pl
from jax.experimental.pallas import tpu as pltpu

# ---------------- constants (from the module's const) ----------------
BOX_FEAT_SIZE = 21        # const.box_feat_size
NUM_OBJECTS   = 80        # const.num_objects
NUM_VERBS     = 117       # const.num_verbs
USE_LOG_FEAT  = True
USE_OBJ_LABEL = True
HIDDEN        = NUM_VERBS                         # hidden units = [num_verbs]*2
IN_DIM        = 2 * BOX_FEAT_SIZE + NUM_OBJECTS   # 122
PAD           = 128                               # lane-padded feature width
LOG_EPS       = 1e-6
BN_EPS        = 1e-5
MAX_TILE_B    = 1024


def _round_up(x, m):
    return ((x + m - 1) // m) * m


def _batch_tiling(b, max_tile=MAX_TILE_B):
    """Pick (tile_b, padded_b, steps).

    tile_b is a multiple of 8; padded_b = steps * tile_b with padded_b - b <=
    8 * steps (a few rows, not up to a whole tile).  steps >= 2 whenever b > 8
    so the 'parallel' batch axis can be sharded across both v7x TensorCores.
    """
    b8 = _round_up(max(b, 1), 8)
    if b8 <= 8:
        return 8, 8, 1
    steps = max(2, pl.cdiv(b8, max_tile))
    tile = _round_up(pl.cdiv(b8, steps), 8)
    return tile, steps * tile, steps


# ---------------- Pallas kernel: fused transform + 3-layer MLP ----------------
def _verb_mlp_kernel(box_ref, obj_ref, wbl_ref, wbig_ref, b_ref, out_ref):
    box = box_ref[...]                                   # [TB, 21] f32
    b_all = b_ref[...]                                   # [3, 128] f32

    # ---- layer 1: transform_feat + concat + Linear(+folded BN), decomposed ----
    h = jnp.dot(box, wbl_ref[0], preferred_element_type=jnp.float32)
    if USE_LOG_FEAT:
        log_box = jnp.log(jnp.abs(box) + LOG_EPS)        # EUP slot (free-ish)
        h = h + jnp.dot(log_box, wbl_ref[1], preferred_element_type=jnp.float32)
    if USE_OBJ_LABEL:
        obj_id = obj_ref[...]                            # [TB, 1] int32
        lanes = jax.lax.broadcasted_iota(jnp.int32, (box.shape[0], PAD), 1)
        onehot = (lanes == obj_id).astype(jnp.float32)   # [TB, 128] (lanes>=80 never hot)
        h = h + jnp.dot(onehot, wbig_ref[0], preferred_element_type=jnp.float32)
    h = jnp.maximum(h + b_all[0:1, :], 0.0)              # ReLU (BN folded)

    # ---- layer 2 ----
    h = jnp.dot(h, wbig_ref[1], preferred_element_type=jnp.float32) + b_all[1:2, :]
    h = jnp.maximum(h, 0.0)                              # ReLU (BN folded)

    # ---- layer 3 (Identity activation) ----
    out = jnp.dot(h, wbig_ref[2], preferred_element_type=jnp.float32) + b_all[2:3, :]
    out_ref[...] = out.astype(out_ref.dtype)


def verb_given_boxes_and_object_label(box_feat, object_ids, params,
                                      max_tile_b=MAX_TILE_B,
                                      out_dtype=jnp.float32,
                                      return_padded=False):
    """box_feat: [B, 21] float, object_ids: [B] int (object class id).

    Returns [B, NUM_VERBS] scores, or the lane/batch-padded [B_pad, 128]
    kernel output when return_padded=True (skips the final slice copy;
    rows >= B and lanes >= NUM_VERBS are padding).
    """
    wbl, wbig, ball = params
    B = box_feat.shape[0]

    box = box_feat.astype(jnp.float32)
    ids = object_ids.reshape(B, 1).astype(jnp.int32)

    tile_b, b_pad, steps = _batch_tiling(B, max_tile_b)
    if b_pad != B:
        box = jnp.pad(box, ((0, b_pad - B), (0, 0)))
        ids = jnp.pad(ids, ((0, b_pad - B), (0, 0)))
    grid = (steps,)

    out_itemsize = jnp.dtype(out_dtype).itemsize
    flops = 2 * b_pad * (2 * BOX_FEAT_SIZE * PAD + 3 * PAD * PAD)
    bytes_accessed = (b_pad * BOX_FEAT_SIZE * 4 + b_pad * 4
                      + (2 * BOX_FEAT_SIZE * PAD + 3 * PAD * PAD + 3 * PAD) * 4
                      + b_pad * PAD * out_itemsize)

    out = pl.pallas_call(
        _verb_mlp_kernel,
        out_shape=jax.ShapeDtypeStruct((b_pad, PAD), out_dtype),
        grid=grid,
        in_specs=[
            pl.BlockSpec((tile_b, BOX_FEAT_SIZE), lambda i: (i, 0)),   # box tile
            pl.BlockSpec((tile_b, 1), lambda i: (i, 0)),               # object ids
            pl.BlockSpec((2, BOX_FEAT_SIZE, PAD), lambda i: (0, 0, 0)),  # W1 box/log parts
            pl.BlockSpec((3, PAD, PAD), lambda i: (0, 0, 0)),          # W1_obj, W2, W3
            pl.BlockSpec((3, PAD), lambda i: (0, 0)),                  # b1, b2, b3
        ],
        out_specs=pl.BlockSpec((tile_b, PAD), lambda i: (i, 0)),
        compiler_params=pltpu.CompilerParams(
            dimension_semantics=("parallel",),
            vmem_limit_bytes=32 * 1024 * 1024),
        cost_estimate=pl.CostEstimate(
            flops=flops,
            transcendentals=b_pad * BOX_FEAT_SIZE if USE_LOG_FEAT else 0,
            bytes_accessed=bytes_accessed),
    )(box, ids, wbl, wbig, ball)

    if return_padded:
        return out
    return out[:B, :NUM_VERBS]


def verb_given_boxes_and_object_label_from_one_hot(box_feat, object_one_hot,
                                                   params, **kw):
    """Compat entry point matching the module signature (dense one-hot input)."""
    ids = jnp.argmax(object_one_hot, axis=-1).astype(jnp.int32)
    return verb_given_boxes_and_object_label(box_feat, ids, params, **kw)


# ---------------- deterministic parameter construction (glue) ----------------
def _fold_bn(w, b, gamma, beta, mean, var):
    """Fold eval-mode BatchNorm1d into the preceding Linear (w: [in, out])."""
    scale = gamma / jnp.sqrt(var + BN_EPS)
    return w * scale[None, :], (b - mean) * scale + beta


def make_params(key):
    ks = jax.random.split(key, 10)
    # Linear weights stored as [in, out] (y = x @ W + b == PyTorch's x @ W.T + b)
    w1 = jax.random.normal(ks[0], (IN_DIM, HIDDEN), jnp.float32) * 0.05
    b1 = jax.random.normal(ks[1], (HIDDEN,), jnp.float32) * 0.05
    w2 = jax.random.normal(ks[2], (HIDDEN, HIDDEN), jnp.float32) * 0.05
    b2 = jax.random.normal(ks[3], (HIDDEN,), jnp.float32) * 0.05
    w3 = jax.random.normal(ks[4], (HIDDEN, NUM_VERBS), jnp.float32) * 0.05
    b3 = jax.random.normal(ks[5], (NUM_VERBS,), jnp.float32) * 0.05
    # BatchNorm1d params for the two hidden layers (eval mode)
    g1  = 1.0 + 0.1 * jax.random.normal(ks[6], (HIDDEN,), jnp.float32)
    be1 = 0.1 * jax.random.normal(ks[7], (HIDDEN,), jnp.float32)
    m1  = 0.05 * jax.random.normal(ks[8], (HIDDEN,), jnp.float32)
    v1  = 1.0 + 0.1 * jnp.abs(jax.random.normal(ks[9], (HIDDEN,), jnp.float32))
    g2, be2, m2, v2 = g1[::-1], be1[::-1], m1[::-1], v1[::-1]

    w1f, b1f = _fold_bn(w1, b1, g1, be1, m1, v1)
    w2f, b2f = _fold_bn(w2, b2, g2, be2, m2, v2)

    def pad_to(a, shape):
        out = jnp.zeros(shape, jnp.float32)
        return out.at[tuple(slice(0, s) for s in a.shape)].set(a)

    # layer-1 weight split to match the in-kernel decomposition
    wb = pad_to(w1f[:BOX_FEAT_SIZE], (BOX_FEAT_SIZE, PAD))                    # box part
    wl = pad_to(w1f[BOX_FEAT_SIZE:2 * BOX_FEAT_SIZE], (BOX_FEAT_SIZE, PAD))   # log part
    wo = pad_to(w1f[2 * BOX_FEAT_SIZE:], (PAD, PAD))                          # one-hot part
    w2p = pad_to(w2f, (PAD, PAD))
    w3p = pad_to(w3, (PAD, PAD))

    wbl  = jnp.stack([wb, wl])                        # [2, 21, 128]
    wbig = jnp.stack([wo, w2p, w3p])                  # [3, 128, 128]
    ball = jnp.stack([pad_to(b1f, (PAD,)),
                      pad_to(b2f, (PAD,)),
                      pad_to(b3, (PAD,))])            # [3, 128]
    return wbl, wbig, ball


# ---------------- pure-JAX reference for verification ----------------
def reference_forward(box_feat, object_one_hot, params):
    wbl, wbig, ball = params
    w1 = jnp.concatenate([wbl[0], wbl[1], wbig[0][:NUM_OBJECTS]], axis=0)[:, :HIDDEN]
    b1 = ball[0, :HIDDEN]
    w2 = wbig[1][:HIDDEN, :HIDDEN]
    b2 = ball[1, :HIDDEN]
    w3 = wbig[2][:HIDDEN, :NUM_VERBS]
    b3 = ball[2, :NUM_VERBS]

    log_box = jnp.log(jnp.abs(box_feat) + LOG_EPS) if USE_LOG_FEAT else 0.0 * box_feat
    obj = object_one_hot if USE_OBJ_LABEL else 0.0 * object_one_hot
    x = jnp.concatenate([box_feat, log_box, obj], axis=1)

    h1 = jnp.maximum(x @ w1 + b1, 0.0)
    h2 = jnp.maximum(h1 @ w2 + b2, 0.0)
    return h2 @ w3 + b3


if __name__ == "__main__":
    key = jax.random.PRNGKey(0)
    k_box, k_obj, k_par, k_box2, k_obj2 = jax.random.split(key, 5)

    params = make_params(k_par)

    # ---- small batch (as in the module spec) ----
    B = 2
    box_feat = jax.random.normal(k_box, (B, BOX_FEAT_SIZE), jnp.float32)
    obj_ids = jax.random.randint(k_obj, (B,), 0, NUM_OBJECTS, dtype=jnp.int32)
    object_one_hot = jax.nn.one_hot(obj_ids, NUM_OBJECTS, dtype=jnp.float32)

    scores = jax.block_until_ready(
        verb_given_boxes_and_object_label(box_feat, obj_ids, params))
    assert scores.shape == (B, NUM_VERBS)
    ref = reference_forward(box_feat, object_one_hot, params)
    assert jnp.allclose(scores, ref, rtol=2e-2, atol=2e-2), "mismatch (small batch)"

    # ---- larger batch: >=2 grid steps, minimal batch padding, one-hot compat path ----
    B2 = 1040  # -> tile_b=520, padded_b=1040 (no waste), grid=(2,)
    box2 = jax.random.normal(k_box2, (B2, BOX_FEAT_SIZE), jnp.float32)
    ids2 = jax.random.randint(k_obj2, (B2,), 0, NUM_OBJECTS, dtype=jnp.int32)
    oh2 = jax.nn.one_hot(ids2, NUM_OBJECTS, dtype=jnp.float32)

    scores2 = jax.block_until_ready(
        verb_given_boxes_and_object_label_from_one_hot(box2, oh2, params))
    assert scores2.shape == (B2, NUM_VERBS)
    ref2 = reference_forward(box2, oh2, params)
    assert jnp.allclose(scores2, ref2, rtol=2e-2, atol=2e-2), "mismatch (tiled batch)"

    print("KERNEL_OK")
</pallas_src>

<mosaic_0001>
module attributes {stable_mosaic.version = 11 : i64} {
  func.func @_verb_mlp_kernel(%arg0: i32, %arg1: memref<8x21xf32, #tpu.memory_space<vmem>>, %arg2: memref<8x1xi32, #tpu.memory_space<vmem>>, %arg3: memref<2x21x128xf32, #tpu.memory_space<vmem>>, %arg4: memref<3x128x128xf32, #tpu.memory_space<vmem>>, %arg5: memref<3x128xf32, #tpu.memory_space<vmem>>, %arg6: memref<8x128xf32, #tpu.memory_space<vmem>>) attributes {dimension_semantics = [#tpu.dimension_semantics<parallel>], iteration_bounds = array<i64: 1>, scalar_prefetch = 0 : i64, scratch_operands = 0 : i64, tpu.core_type = #tpu.core_type<tc>, window_params = [{transform_indices = @transform_0, window_bounds = array<i64: 8, 21>}, {transform_indices = @transform_1, window_bounds = array<i64: 8, 1>}, {pipeline_mode = #tpu.pipeline_mode<synchronous>, transform_indices = @transform_2, window_bounds = array<i64: 2, 21, 128>}, {pipeline_mode = #tpu.pipeline_mode<synchronous>, transform_indices = @transform_3, window_bounds = array<i64: 3, 128, 128>}, {pipeline_mode = #tpu.pipeline_mode<synchronous>, transform_indices = @transform_4, window_bounds = array<i64: 3, 128>}, {transform_indices = @transform_5, window_bounds = array<i64: 8, 128>}]} {
    %c0 = arith.constant 0 : index
    %c0_0 = arith.constant 0 : index
    %0 = vector.load %arg1[%c0, %c0_0] : memref<8x21xf32, #tpu.memory_space<vmem>>, vector<8x21xf32>
    %c0_1 = arith.constant 0 : index
    %c0_2 = arith.constant 0 : index
    %1 = vector.load %arg5[%c0_1, %c0_2] : memref<3x128xf32, #tpu.memory_space<vmem>>, vector<3x128xf32>
    %c0_3 = arith.constant 0 : index
    %c0_4 = arith.constant 0 : index
    %c0_5 = arith.constant 0 : index
    %2 = vector.load %arg3[%c0_3, %c0_4, %c0_5] : memref<2x21x128xf32, #tpu.memory_space<vmem>>, vector<1x21x128xf32>
    %3 = vector.shape_cast %2 : vector<1x21x128xf32> to vector<21x128xf32>
    %cst = arith.constant dense<0.000000e+00> : vector<8x128xf32>
    %4 = tpu.matmul %0, %3, %cst {dimension_numbers = #tpu.dot_dimension_numbers<[1], [0], [0], [1], [0, 0, 1, 1], [], []>} : vector<8x21xf32>, vector<21x128xf32>, vector<8x128xf32> -> vector<8x128xf32>
    %5 = math.absf %0 : vector<8x21xf32>
    %cst_6 = arith.constant 9.99999997E-7 : f32
    %6 = vector.broadcast %cst_6 : f32 to vector<8x21xf32>
    %7 = arith.addf %5, %6 : vector<8x21xf32>
    %8 = math.log %7 : vector<8x21xf32>
    %c1 = arith.constant 1 : index
    %c0_7 = arith.constant 0 : index
    %c0_8 = arith.constant 0 : index
    %9 = vector.load %arg3[%c1, %c0_7, %c0_8] : memref<2x21x128xf32, #tpu.memory_space<vmem>>, vector<1x21x128xf32>
    %10 = vector.shape_cast %9 : vector<1x21x128xf32> to vector<21x128xf32>
    %cst_9 = arith.constant dense<0.000000e+00> : vector<8x128xf32>
    %11 = tpu.matmul %8, %10, %cst_9 {dimension_numbers = #tpu.dot_dimension_numbers<[1], [0], [0], [1], [0, 0, 1, 1], [], []>} : vector<8x21xf32>, vector<21x128xf32>, vector<8x128xf32> -> vector<8x128xf32>
    %12 = arith.addf %4, %11 : vector<8x128xf32>
    %c0_10 = arith.constant 0 : index
    %c0_11 = arith.constant 0 : index
    %13 = vector.load %arg2[%c0_10, %c0_11] : memref<8x1xi32, #tpu.memory_space<vmem>>, vector<8x1xi32>
    %14 = tpu.iota {dimensions = array<i32: 1>} : vector<8x128xi32>
    %15 = vector.broadcast %13 : vector<8x1xi32> to vector<8x128xi32>
    %16 = arith.cmpi eq, %14, %15 : vector<8x128xi32>
    %17 = arith.extui %16 : vector<8x128xi1> to vector<8x128xi32>
    %18 = arith.sitofp %17 : vector<8x128xi32> to vector<8x128xf32>
    %c0_12 = arith.constant 0 : index
    %c0_13 = arith.constant 0 : index
    %c0_14 = arith.constant 0 : index
    %19 = vector.load %arg4[%c0_12, %c0_13, %c0_14] : memref<3x128x128xf32, #tpu.memory_space<vmem>>, vector<1x128x128xf32>
    %20 = vector.shape_cast %19 : vector<1x128x128xf32> to vector<128x128xf32>
    %cst_15 = arith.constant dense<0.000000e+00> : vector<8x128xf32>
    %21 = tpu.matmul %18, %20, %cst_15 {dimension_numbers = #tpu.dot_dimension_numbers<[1], [0], [0], [1], [0, 0, 1, 1], [], []>} : vector<8x128xf32>, vector<128x128xf32>, vector<8x128xf32> -> vector<8x128xf32>
    %22 = arith.addf %12, %21 : vector<8x128xf32>
    %23 = vector.extract_strided_slice %1 {offsets = [0, 0], sizes = [1, 128], strides = [1, 1]} : vector<3x128xf32> to vector<1x128xf32>
    %24 = vector.broadcast %23 : vector<1x128xf32> to vector<8x128xf32>
    %25 = arith.addf %22, %24 : vector<8x128xf32>
    %cst_16 = arith.constant 0.000000e+00 : f32
    %26 = vector.broadcast %cst_16 : f32 to vector<8x128xf32>
    %27 = arith.maximumf %25, %26 : vector<8x128xf32>
    %c1_17 = arith.constant 1 : index
    %c0_18 = arith.constant 0 : index
    %c0_19 = arith.constant 0 : index
    %28 = vector.load %arg4[%c1_17, %c0_18, %c0_19] : memref<3x128x128xf32, #tpu.memory_space<vmem>>, vector<1x128x128xf32>
    %29 = vector.shape_cast %28 : vector<1x128x128xf32> to vector<128x128xf32>
    %cst_20 = arith.constant dense<0.000000e+00> : vector<8x128xf32>
    %30 = tpu.matmul %27, %29, %cst_20 {dimension_numbers = #tpu.dot_dimension_numbers<[1], [0], [0], [1], [0, 0, 1, 1], [], []>} : vector<8x128xf32>, vector<128x128xf32>, vector<8x128xf32> -> vector<8x128xf32>
    %31 = vector.extract_strided_slice %1 {offsets = [1, 0], sizes = [1, 128], strides = [1, 1]} : vector<3x128xf32> to vector<1x128xf32>
    %32 = vector.broadcast %31 : vector<1x128xf32> to vector<8x128xf32>
    %33 = arith.addf %30, %32 : vector<8x128xf32>
    %cst_21 = arith.constant 0.000000e+00 : f32
    %34 = vector.broadcast %cst_21 : f32 to vector<8x128xf32>
    %35 = arith.maximumf %33, %34 : vector<8x128xf32>
    %c2 = arith.constant 2 : index
    %c0_22 = arith.constant 0 : index
    %c0_23 = arith.constant 0 : index
    %36 = vector.load %arg4[%c2, %c0_22, %c0_23] : memref<3x128x128xf32, #tpu.memory_space<vmem>>, vector<1x128x128xf32>
    %37 = vector.shape_cast %36 : vector<1x128x128xf32> to vector<128x128xf32>
    %cst_24 = arith.constant dense<0.000000e+00> : vector<8x128xf32>
    %38 = tpu.matmul %35, %37, %cst_24 {dimension_numbers = #tpu.dot_dimension_numbers<[1], [0], [0], [1], [0, 0, 1, 1], [], []>} : vector<8x128xf32>, vector<128x128xf32>, vector<8x128xf32> -> vector<8x128xf32>
    %39 = vector.extract_strided_slice %1 {offsets = [2, 0], sizes = [1, 128], strides = [1, 1]} : vector<3x128xf32> to vector<1x128xf32>
    %40 = vector.broadcast %39 : vector<1x128xf32> to vector<8x128xf32>
    %41 = arith.addf %38, %40 : vector<8x128xf32>
    %c0_25 = arith.constant 0 : index
    %c0_26 = arith.constant 0 : index
    %42 = vector.load %arg6[%c0_25, %c0_26] : memref<8x128xf32, #tpu.memory_space<vmem>>, vector<8x128xf32>
    tpu.vector_store %arg6[%c0_25, %c0_26], %41 {strides = array<i32>} : memref<8x128xf32, #tpu.memory_space<vmem>>, vector<8x128xf32>,
    return
  }
  func.func @transform_0(%arg0: i32) -> (i32, i32) {
    %c0_i32 = arith.constant 0 : i32
    %c0_i32_0 = arith.constant 0 : i32
    return %arg0, %c0_i32 : i32, i32
  }
  func.func @transform_1(%arg0: i32) -> (i32, i32) {
    %c0_i32 = arith.constant 0 : i32
    %c0_i32_0 = arith.constant 0 : i32
    return %arg0, %c0_i32 : i32, i32
  }
  func.func @transform_2(%arg0: i32) -> (i32, i32, i32) {
    %c0_i32 = arith.constant 0 : i32
    %c0_i32_0 = arith.constant 0 : i32
    %c0_i32_1 = arith.constant 0 : i32
    %c0_i32_2 = arith.constant 0 : i32
    return %c0_i32, %c0_i32_0, %c0_i32_1 : i32, i32, i32
  }
  func.func @transform_3(%arg0: i32) -> (i32, i32, i32) {
    %c0_i32 = arith.constant 0 : i32
    %c0_i32_0 = arith.constant 0 : i32
    %c0_i32_1 = arith.constant 0 : i32
    %c0_i32_2 = arith.constant 0 : i32
    return %c0_i32, %c0_i32_0, %c0_i32_1 : i32, i32, i32
  }
  func.func @transform_4(%arg0: i32) -> (i32, i32) {
    %c0_i32 = arith.constant 0 : i32
    %c0_i32_0 = arith.constant 0 : i32
    %c0_i32_1 = arith.constant 0 : i32
    return %c0_i32, %c0_i32_0 : i32, i32
  }
  func.func @transform_5(%arg0: i32) -> (i32, i32) {
    %c0_i32 = arith.constant 0 : i32
    %c0_i32_0 = arith.constant 0 : i32
    return %arg0, %c0_i32 : i32, i32
  }
}

</mosaic_0001>

<bundles_post_ra>
// kernel: tpu_custom_call.1
= control target key start
LH: loop header
LB: loop body
LE: loop exit
PB: predicated region body
PF: predicated region fallthrough
CT: control target
= control target key end

     0   :  { %10 = vsyncpa [#allocation3], 0  ;;  %s888_s0 = inlined_call_operand.vmem [shape: f32[8,21], index: 0, kind: input, shape index: {}]   ;;  %s889_s1 = inlined_call_operand.vmem [shape: s32[8,1], index: 1, kind: input, shape index: {}]   ;;  %s890_s2 = inlined_call_operand.vmem [shape: f32[2,21,128], index: 2, kind: input, shape index: {}]   ;;  %s891_s3 = inlined_call_operand.hbm [shape: f32[3,128,128], index: 3, kind: input, shape index: {}]   ;;  %s892_s4 = inlined_call_operand.vmem [shape: f32[3,128], index: 4, kind: input, shape index: {}]   ;;  %s893_s5 = inlined_call_operand.hbm [shape: f32[8,128], index: 5, kind: output, shape index: {}]  }
   0x1   :  { %11 = vsyncpa [#allocation4], 0  ;;  %s749_s18 = smov [#allocation2]  }
   0x2   :  { %s23_s19 = sshll.u32 %s749_s18, 4  ;;  %s24_s19 = int_to_ptr.vmem [resolvable:$true] %s23_s19 }
   0x3   :  { %s713_s20 = scalar_lea.vmem %s24_s19, 6144  ;;  %p718_p1 = scmp.lt.s32.totalorder %s24_s19, %s24_s19 }
   0x4   :  { %p714_p0 = scmp.ne.s32.totalorder %s24_s19, %s713_s20  ;;  %p719_p2 = scmp.lt.s32.totalorder %s713_s20, %s713_s20 }
   0x6   :  { %p720_p3 = por %p719_p2, %p718_p1 }
   0x8   :  { %p721_p4 = pnand %p720_p3, %p714_p0 }
   0xa   :  { %724 = shalt.err (!%p721_p4)
}
   0xb   :  { %s750_s21 = smov 128   ;;  %s751_s22 = smov 8  }
   0xc   :  { %29 = dma.hbm_to_vmem [thread:$0]  %s891_s3, 6144, %s24_s19, [#allocation3], %s750_s21, %s750_s21, %s751_s22  }
   0xd   :  { %745 = dma.done.wait [#allocation3], 6144  }
   0xe   :  { %746 = vsyncadd [#allocation3], 4294961152  ;;  %v752_v0 = vmov 0   ;;  %v753_v1 = vmov 0.0   ;;  %vm754_vm0 = vmmov 0   ;;  %v202_v2 = vld [vmem:[%s889_s1] sm:$0xff]  ;;  %v203_v42 = vlaneseq }
   0xf   :  { %702 = vset.pattern.permute.xlu0 %v752_v0  ;;  %589 = vmatprep.subr.mxu0 %v753_v1  ;;  %v226_v3 = vld [vmem:[#allocation2 + $0x78] sm:$0xff]  ;;  %v225_v4 = vld [vmem:[#allocation2 + $0x70] sm:$0xff]  ;;  %vm52_vm1 = vcmask 1044480   ;;  %v224_v5 = vld [vmem:[#allocation2 + $0x68] sm:$0xff]  ;;  %vm48_vm2 = vcmask 171008   ;;  %v755_v45 = vmov 1.0  }
  0x10   :  { %571 = vmatprep.subr.mxu1 %v753_v1  ;;  %577 = vmatprep.mubr.msk.f32.mxu1 %vm754_vm0, %v753_v1  ;;  %v505_v6 = vld [vmem:[%s890_s2 + $0x28] sm:$0x1f]  ;;  %v504_v7 = vld [vmem:[%s890_s2 + $0x20] sm:$0xff]  ;;  %v503_v9 = vld [vmem:[%s890_s2 + $0x18] sm:$0xff]  ;;  %v204_v43 = vand.u32 127, %v203_v42 }
  0x11   :  { %621 = vmatprep.mubr.msk.f32.mxu0 %vm754_vm0, %v753_v1  ;;  %206 = vperm.xlu0 %702, %v202_v2   ;;  %v223_v8 = vld [vmem:[#allocation2 + $0x60] sm:$0xff]  ;;  %v222_v12 = vld [vmem:[#allocation2 + $0x58] sm:$0xff]  ;;  %v221_v14 = vld [vmem:[#allocation2 + $0x50] sm:$0xff] }
  0x12   :  { %590 = vmatpush3.msra.mxu0 %v226_v3  ;;  %572 = vmatpush3.msk.msra.mxu1 %vm52_vm1, %v505_v6  ;;  %v35_v10 = vld [vmem:[%s888_s0] sm:$0xff]  ;;  %v220_v15 = vld [vmem:[#allocation2 + $0x48] sm:$0xff]  ;;  %v218_v17 = vld [vmem:[#allocation2 + $0x38] sm:$0xff] }
  0x13   :  { %591 = vmatprep.subr.mxu0 %v753_v1  ;;  %573 = vmatprep.subr.mxu1 %v753_v1  ;;  %v40_v11 = vand.u32 2147483647, %v35_v10  ;;  %v219_v16 = vld [vmem:[#allocation2 + $0x40] sm:$0xff]  ;;  %v217_v18 = vld [vmem:[#allocation2 + $0x30] sm:$0xff]  ;;  %v216_v19 = vld [vmem:[#allocation2 + $0x28] sm:$0xff] }
  0x14   :  { %592 = vmatpush3.msra.mxu0 %v225_v4  ;;  %574 = vmatpush3.msra.mxu1 %v504_v7  ;;  %v215_v20 = vld [vmem:[#allocation2 + $0x20] sm:$0xff]  ;;  %v214_v22 = vld [vmem:[#allocation2 + $0x18] sm:$0xff]  ;;  %v39_v24 = vld [vmem:[%s890_s2 + $0x10] sm:$0x1f] }
  0x15   :  { %593 = vmatprep.subr.mxu0 %v753_v1  ;;  %575 = vmatprep.subr.mxu1 %v753_v1  ;;  %v41_v13 = vadd.f32 1e-06, %v40_v11  ;;  %v38_v25 = vld [vmem:[%s890_s2 + $0x8] sm:$0xff]  ;;  %v213_v26 = vld [vmem:[#allocation2 + $0x10] sm:$0xff]  ;;  %v37_v27 = vld [vmem:[%s890_s2] sm:$0xff] }
  0x16   :  { %594 = vmatpush3.msra.mxu0 %v224_v5  ;;  %576 = vmatpush3.msra.mxu1 %v503_v9  ;;  %v212_v28 = vld [vmem:[#allocation2 + $0x8] sm:$0xff]  ;;  %v211_v29 = vld [vmem:[#allocation2] sm:$0xff]  ;;  %v320_v30 = vld [vmem:[#allocation2 + $0xf8] sm:$0xff]  ;;  %v299_v5 = vshrl.u32 %v203_v42, 7 }
  0x17   :  { %595 = vmatprep.subr.mxu0 %v753_v1  ;;  %580 = vmatprep.subr.mxu1 %v753_v1  ;;  %703 = vlog2.f32 %v41_v13  ;;  %v319_v31 = vld [vmem:[#allocation2 + $0xf0] sm:$0xff]  ;;  %v318_v32 = vld [vmem:[#allocation2 + $0xe8] sm:$0xff]  ;;  %v317_v33 = vld [vmem:[#allocation2 + $0xe0] sm:$0xff] }
  0x18   :  { %596 = vmatpush3.msra.mxu0 %v223_v8  ;;  %v316_v34 = vld [vmem:[#allocation2 + $0xd8] sm:$0xff]  ;;  %v315_v35 = vld [vmem:[#allocation2 + $0xd0] sm:$0xff]  ;;  %v314_v36 = vld [vmem:[#allocation2 + $0xc8] sm:$0xff]  ;;  %v300_v6 = vsub.s32 0, %v299_v5 }
  0x19   :  { %597 = vmatprep.subr.mxu0 %v753_v1  ;;  %v313_v37 = vld [vmem:[#allocation2 + $0xc0] sm:$0xff]  ;;  %v312_v38 = vld [vmem:[#allocation2 + $0xb8] sm:$0xff]  ;;  %v311_v39 = vld [vmem:[#allocation2 + $0xb0] sm:$0xff] }
  0x1a   :  { %598 = vmatpush3.msra.mxu0 %v222_v12  ;;  %v310_v40 = vld [vmem:[#allocation2 + $0xa8] sm:$0xff]  ;;  %v309_v41 = vld [vmem:[#allocation2 + $0xa0] sm:$0xff]  ;;  %v308_v46 = vld [vmem:[#allocation2 + $0x98] sm:$0xff] }
  0x1b   :  { %599 = vmatprep.subr.mxu0 %v753_v1  ;;  %v307_v47 = vld [vmem:[#allocation2 + $0x90] sm:$0xff]  ;;  %v306_v48 = vld [vmem:[#allocation2 + $0x88] sm:$0xff]  ;;  %v305_v49 = vld [vmem:[#allocation2 + $0x80] sm:$0xff] }
  0x1c   :  { %600 = vmatpush3.msra.mxu0 %v221_v14  ;;  %v412_v50 = vld [vmem:[#allocation2 + $0x178] sm:$0xff]  ;;  %v411_v51 = vld [vmem:[#allocation2 + $0x170] sm:$0xff]  ;;  %v410_v52 = vld [vmem:[#allocation2 + $0x168] sm:$0xff] }
  0x1d   :  { %601 = vmatprep.subr.mxu0 %v753_v1  ;;  %v409_v53 = vld [vmem:[#allocation2 + $0x160] sm:$0xff]  ;;  %v408_v54 = vld [vmem:[#allocation2 + $0x158] sm:$0xff]  ;;  %v407_v55 = vld [vmem:[#allocation2 + $0x150] sm:$0xff] }
  0x1e   :  { %602 = vmatpush3.msra.mxu0 %v220_v15  ;;  %v406_v56 = vld [vmem:[#allocation2 + $0x148] sm:$0xff]  ;;  %v405_v57 = vld [vmem:[#allocation2 + $0x140] sm:$0xff]  ;;  %v404_v58 = vld [vmem:[#allocation2 + $0x138] sm:$0xff] }
  0x1f   :  { %603 = vmatprep.subr.mxu0 %v753_v1  ;;  %v403_v59 = vld [vmem:[#allocation2 + $0x130] sm:$0xff]  ;;  %v402_v60 = vld [vmem:[#allocation2 + $0x128] sm:$0xff]  ;;  %v401_v62 = vld [vmem:[#allocation2 + $0x120] sm:$0xff] }
  0x20   :  { %604 = vmatpush3.msra.mxu0 %v219_v16  ;;  %v400_v0 = vld [vmem:[#allocation2 + $0x118] sm:$0xff]  ;;  %v36_v7 = vld [vmem:[%s892_s4] sm:$0x7]  ;;  %v399_v14 = vld [vmem:[#allocation2 + $0x110] sm:$0xff]  ;;  %s756_s4 = smov [#allocation5]  }
  0x21   :  { %605 = vmatprep.subr.mxu0 %v753_v1  ;;  %v301_v8 = vrot.slane %v36_v7, %v300_v6  ;;  %v398_v15 = vld [vmem:[#allocation2 + $0x108] sm:$0xff]  ;;  %v397_v16 = vld [vmem:[#allocation2 + $0x100] sm:$0xff]  ;;  %s494_s14 = sshll.u32 %s756_s4, 4  ;;  %s495_s14 = int_to_ptr.vmem [resolvable:$true] %s494_s14 }
  0x22   :  { %606 = vmatpush3.msra.mxu0 %v218_v17  ;;  %v323_v17 = vsub.s32 1, %v299_v5  ;;  %s725_s15 = scalar_lea.vmem %s495_s14, 128  ;;  %p730_p6 = scmp.lt.s32.totalorder %s495_s14, %s495_s14 }
  0x23   :  { %607 = vmatprep.subr.mxu0 %v753_v1  ;;  %p726_p5 = scmp.ne.s32.totalorder %s495_s14, %s725_s15  ;;  %p731_p7 = scmp.lt.s32.totalorder %s725_s15, %s725_s15 }
  0x24   :  { %608 = vmatpush3.msra.mxu0 %v217_v18  ;;  %v704_v21 = vpop.eup %703  ;;  %v324_v18 = vrot.slane %v36_v7, %v323_v17 }
  0x25   :  { %609 = vmatprep.subr.mxu0 %v753_v1  ;;  %v43_v23 = vmul.f32 0.6931472, %v704_v21  ;;  %p732_p8 = por %p731_p7, %p730_p6 }
  0x26   :  { %610 = vmatpush3.msra.mxu0 %v216_v19 }
  0x27   :  { %611 = vmatprep.subr.mxu0 %v753_v1  ;;  %578 = vmatmul.mubr.msk.f32.vlgmr.msra.gmra.mxu1 %vm48_vm2, %v43_v23  ;;  %v415_v23 = vsub.s32 2, %v299_v5  ;;  %p733_p9 = pnand %p732_p8, %p726_p5 }
  0x28   :  { %612 = vmatpush3.msra.mxu0 %v215_v20  ;;  %581 = vmatpush3.msk.msra.mxu1 %vm52_vm1, %v39_v24 }
  0x29   :  { %613 = vmatprep.subr.mxu0 %v753_v1  ;;  %586 = vmatprep.mubr.msk.f32.mxu1 %vm754_vm0, %v753_v1  ;;  %v416_v24 = vrot.slane %v36_v7, %v415_v23 }
  0x2a   :  { %614 = vmatpush3.msra.mxu0 %v214_v22  ;;  %582 = vmatprep.subr.mxu1 %v753_v1 }
  0x2b   :  { %615 = vmatprep.subr.mxu0 %v753_v1  ;;  %583 = vmatpush3.msra.mxu1 %v38_v25 }
  0x2c   :  { %616 = vmatpush3.msra.mxu0 %v213_v26  ;;  %584 = vmatprep.subr.mxu1 %v753_v1 }
  0x2d   :  { %617 = vmatprep.subr.mxu0 %v753_v1  ;;  %585 = vmatpush3.msra.mxu1 %v37_v27 }
  0x2e   :  { %618 = vmatpush3.msra.mxu0 %v212_v28  ;;  %587 = vmatmul.mubr.msk.f32.vlgmr.msra.gmra.mxu1 %vm48_vm2, %v35_v10 }
  0x2f   :  { %619 = vmatprep.subr.mxu0 %v753_v1  ;;  %624 = vmatprep.subr.mxu1 %v753_v1 }
  0x30   :  { %620 = vmatpush3.msra.mxu0 %v211_v29  ;;  %625 = vmatpush3.msra.mxu1 %v320_v30 }
  0x31   :  { %656 = vmatprep.mubr.msk.f32.mxu1 %vm754_vm0, %v753_v1  ;;  %626 = vmatprep.subr.mxu1 %v753_v1 }
  0x32   :  { %659 = vmatprep.subr.mxu0 %v753_v1  ;;  %627 = vmatpush3.msra.mxu1 %v319_v31 }
  0x33   :  { %628 = vmatprep.subr.mxu1 %v753_v1 }
  0x34   :  { %629 = vmatpush3.msra.mxu1 %v318_v32 }
  0x35   :  { %630 = vmatprep.subr.mxu1 %v753_v1 }
  0x36   :  { %631 = vmatpush3.msra.mxu1 %v317_v33 }
  0x37   :  { %632 = vmatprep.subr.mxu1 %v753_v1 }
  0x38   :  { %633 = vmatpush3.msra.mxu1 %v316_v34 }
  0x39   :  { %634 = vmatprep.subr.mxu1 %v753_v1 }
  0x3a   :  { %635 = vmatpush3.msra.mxu1 %v315_v35 }
  0x3b   :  { %636 = vmatprep.subr.mxu1 %v753_v1 }
  0x3c   :  { %637 = vmatpush3.msra.mxu1 %v314_v36 }
  0x3d   :  { %638 = vmatprep.subr.mxu1 %v753_v1 }
  0x3e   :  { %639 = vmatpush3.msra.mxu1 %v313_v37 }
  0x3f   :  { %640 = vmatprep.subr.mxu1 %v753_v1 }
  0x40   :  { %641 = vmatpush3.msra.mxu1 %v312_v38 }
  0x41   :  { %642 = vmatprep.subr.mxu1 %v753_v1 }
  0x42   :  { %643 = vmatpush3.msra.mxu1 %v311_v39 }
  0x43   :  { %644 = vmatprep.subr.mxu1 %v753_v1 }
  0x44   :  { %645 = vmatpush3.msra.mxu1 %v310_v40 }
  0x45   :  { %646 = vmatprep.subr.mxu1 %v753_v1 }
  0x46   :  { %647 = vmatpush3.msra.mxu1 %v309_v41 }
  0x47   :  { %648 = vmatprep.subr.mxu1 %v753_v1 }
  0x48   :  { %649 = vmatpush3.msra.mxu1 %v308_v46 }
  0x49   :  { %650 = vmatprep.subr.mxu1 %v753_v1 }
  0x4a   :  { %651 = vmatpush3.msra.mxu1 %v307_v47 }
  0x4b   :  { %652 = vmatprep.subr.mxu1 %v753_v1 }
  0x4c   :  { %653 = vmatpush3.msra.mxu1 %v306_v48 }
  0x4d   :  { %654 = vmatprep.subr.mxu1 %v753_v1 }
  0x4e   :  { %655 = vmatpush3.msra.mxu1 %v305_v49 }
  0x8c   :  { %v207_v44 = vpop.permute.xlu0 %206 }
  0x8d   :  { %vm208_vm3 = vcmp.eq.s32.totalorder %v204_v43, %v207_v44 }
  0x8e   :  { %622 = vmatmul.mubr.msk.f32.vlgmr.msra.gmra.mxu0 %vm208_vm3, %v755_v45 }
  0x8f   :  { %691 = vmatprep.mubr.msk.f32.mxu0 %vm754_vm0, %v753_v1  ;;  %660 = vmatpush3.msra.mxu0 %v412_v50 }
  0x90   :  { %661 = vmatprep.subr.mxu0 %v753_v1 }
  0x91   :  { %662 = vmatpush3.msra.mxu0 %v411_v51 }
  0x92   :  { %663 = vmatprep.subr.mxu0 %v753_v1 }
  0x93   :  { %664 = vmatpush3.msra.mxu0 %v410_v52 }
  0x94   :  { %665 = vmatprep.subr.mxu0 %v753_v1 }
  0x95   :  { %666 = vmatpush3.msra.mxu0 %v409_v53 }
  0x96   :  { %667 = vmatprep.subr.mxu0 %v753_v1 }
  0x97   :  { %668 = vmatpush3.msra.mxu0 %v408_v54 }
  0x98   :  { %669 = vmatprep.subr.mxu0 %v753_v1 }
  0x99   :  { %670 = vmatpush3.msra.mxu0 %v407_v55 }
  0x9a   :  { %671 = vmatprep.subr.mxu0 %v753_v1 }
  0x9b   :  { %672 = vmatpush3.msra.mxu0 %v406_v56 }
  0x9c   :  { %673 = vmatprep.subr.mxu0 %v753_v1 }
  0x9d   :  { %674 = vmatpush3.msra.mxu0 %v405_v57 }
  0x9e   :  { %675 = vmatprep.subr.mxu0 %v753_v1 }
  0x9f   :  { %676 = vmatpush3.msra.mxu0 %v404_v58 }
  0xa0   :  { %677 = vmatprep.subr.mxu0 %v753_v1 }
  0xa1   :  { %678 = vmatpush3.msra.mxu0 %v403_v59 }
  0xa2   :  { %679 = vmatprep.subr.mxu0 %v753_v1 }
  0xa3   :  { %680 = vmatpush3.msra.mxu0 %v402_v60 }
  0xa4   :  { %681 = vmatprep.subr.mxu0 %v753_v1 }
  0xa5   :  { %682 = vmatpush3.msra.mxu0 %v401_v62 }
  0xa6   :  { %683 = vmatprep.subr.mxu0 %v753_v1 }
  0xa7   :  { %684 = vmatpush3.msra.mxu0 %v400_v0 }
  0xa8   :  { %685 = vmatprep.subr.mxu0 %v753_v1 }
  0xa9   :  { %686 = vmatpush3.msra.mxu0 %v399_v14 }
  0xaa   :  { %687 = vmatprep.subr.mxu0 %v753_v1 }
  0xab   :  { %688 = vmatpush3.msra.mxu0 %v398_v15 }
  0xac   :  { %689 = vmatprep.subr.mxu0 %v753_v1 }
  0xad   :  { %690 = vmatpush3.msra.mxu0 %v397_v16 }
  0xe7   :  { %v122_v61 = vpop.f32.mrf.mxu1 }
  0xe9   :  { %v579_v63 = vpop.f32.mrf.mxu1 }
  0xee   :  { %v198_v2 = vpop.f32.mrf.mxu1 }
  0xef   :  { %v199_v3 = vadd.f32 %v198_v2, %v122_v61 }
  0xf0   :  { %v588_v4 = vpop.f32.mrf.mxu1 }
 0x14e   :  { %v293_v9 = vpop.f32.mrf.mxu0 }
 0x14f   :  { %v297_v10 = vadd.f32 %v293_v9, %v199_v3 }
 0x150   :  { %v623_v11 = vpop.f32.mrf.mxu0 }
 0x151   :  { %v302_v12 = vadd.f32 %v301_v8, %v297_v10 }
 0x153   :  { %v303_v13 = vmax.f32 %v302_v12, 0.0 }
 0x155   :  { %657 = vmatmul.mubr.f32.vlgmr.msra.gmra.mxu1 %v303_v13 }
 0x215   :  { %v391_v19 = vpop.f32.mrf.mxu1 }
 0x216   :  { %v392_v20 = vadd.f32 %v391_v19, %v324_v18 }
 0x217   :  { %v658_v21 = vpop.f32.mrf.mxu1 }
 0x218   :  { %v395_v22 = vmax.f32 %v392_v20, 0.0 }
 0x21a   :  { %692 = vmatmul.mubr.f32.vlgmr.msra.gmra.mxu0 %v395_v22 }
 0x2da   :  { %v483_v25 = vpop.f32.mrf.mxu0 }
 0x2db   :  { %v484_v26 = vadd.f32 %v483_v25, %v416_v24 }
 0x2dc   :  { %v693_v27 = vpop.f32.mrf.mxu0 }
 0x2dd   :  { %487 = vst [vmem:[#allocation5] sm:$0xff] %v484_v26 }
 0x2de   :  { %736 = shalt.err (!%p733_p9)
}
 0x2df   :  { %497 = dma.vmem_to_hbm [thread:$0]  %s495_s14, 128, %s893_s5, [#allocation4]  }
 0x2e0   :  { %747 = dma.done.wait [#allocation4], 128  }
 0x2e1   :  { %748 = vsyncadd [#allocation4], 4294967168 }
 0x2e2   :  { %501 = vsyncpa [#allocation3], 1 }
 0x2e3   :  { %502 = vsyncpa [#allocation4], 1 }

</bundles_post_ra>
